<compile_context>
chip_gen: v7x
topology: tpu7x:2x2x1
jax: 0.10.0
libtpu: 0.0.40
codegen_flags: <defaults>
</compile_context>

<pallas_src>
import functools

import jax
import jax.numpy as jnp
from jax.experimental import pallas as pl
from jax.experimental.pallas import tpu as pltpu

NUM_CLASSES = 5
IN_DIM = 21 * 3 * 2  # 126
DIMS = [IN_DIM, 80, 64, 32, 20, 10, NUM_CLASSES]
N_LAYERS = 6
PAD = 128  # TPU lane width; every feature dim is zero-padded to this.


def simplenn_kernel(x_ref, w_ref, b_ref, o_ref):
    # x_ref: (TILE_B, 128) bf16, w_ref: (6, 128, 128) bf16, b_ref: (6, 1, 128) f32
    # All dropout layers are identity at inference time.
    h = x_ref[...]
    acc = None
    for j in range(N_LAYERS):
        # bf16 x bf16 MXU matmul with f32 accumulation.
        acc = jnp.dot(h, w_ref[j], preferred_element_type=jnp.float32)
        acc = acc + b_ref[j]  # f32 bias add (v5e VPU has no native bf16)
        if j < N_LAYERS - 1:
            h = jnp.maximum(acc, 0.0).astype(jnp.bfloat16)
    # Final layer: no activation, no softmax (matches torch forward).
    o_ref[...] = acc.astype(o_ref.dtype)


def init_params(key):
    """Deterministic init mimicking torch.nn.Linear default (U[-1/sqrt(fan_in), +])."""
    params = []
    for i in range(N_LAYERS):
        fan_in, fan_out = DIMS[i], DIMS[i + 1]
        key, kw, kb = jax.random.split(key, 3)
        bound = 1.0 / jnp.sqrt(fan_in)
        # Stored transposed relative to torch (in, out) so the kernel does x @ W.
        w = jax.random.uniform(kw, (fan_in, fan_out), jnp.float32, -bound, bound)
        b = jax.random.uniform(kb, (fan_out,), jnp.float32, -bound, bound)
        params.append((w, b))
    return params


def pack_params(params):
    """Pack per-layer (w, b) into lane-dense, zero-padded VMEM slabs."""
    w_slab = jnp.zeros((N_LAYERS, PAD, PAD), jnp.bfloat16)
    b_slab = jnp.zeros((N_LAYERS, 1, PAD), jnp.float32)
    for i, (w, b) in enumerate(params):
        fi, fo = w.shape
        w_slab = w_slab.at[i, :fi, :fo].set(w.astype(jnp.bfloat16))
        b_slab = b_slab.at[i, 0, :fo].set(b)
    return w_slab, b_slab


def _round_up(x, m):
    return (x + m - 1) // m * m


@functools.partial(jax.jit, static_argnames=("tile_b",))
def simplenn_forward(x, w_slab, b_slab, *, tile_b=512):
    B = x.shape[0]
    tb = min(tile_b, _round_up(B, 8))      # small batches -> one full tile
    B_pad = _round_up(B, tb)
    grid = (B_pad // tb,)

    # Zero-pad features 126 -> 128 and batch to a tile multiple; stream bf16.
    x_p = jnp.zeros((B_pad, PAD), jnp.bfloat16).at[:B, :IN_DIM].set(
        x.astype(jnp.bfloat16))

    out = pl.pallas_call(
        simplenn_kernel,
        out_shape=jax.ShapeDtypeStruct((B_pad, PAD), jnp.float32),
        grid=grid,
        in_specs=[
            # activations: tiled over the batch grid axis
            pl.BlockSpec((tb, PAD), lambda i: (i, 0)),
            # weights / biases: constant block index -> stay VMEM-resident
            pl.BlockSpec((N_LAYERS, PAD, PAD), lambda i: (0, 0, 0)),
            pl.BlockSpec((N_LAYERS, 1, PAD), lambda i: (0, 0, 0)),
        ],
        out_specs=pl.BlockSpec((tb, PAD), lambda i: (i, 0)),
        compiler_params=pltpu.CompilerParams(
            dimension_semantics=("parallel",),
            vmem_limit_bytes=64 * 1024 * 1024,
        ),
    )(x_p, w_slab, b_slab)

    # Lane-dense (B_pad, 128) result -> slice the real logits outside the kernel.
    return out[:B, :NUM_CLASSES]


def reference_forward(x, params):
    """Pure-JAX reference using the same numerics (bf16 operands, f32 accum)."""
    h = x.astype(jnp.bfloat16)
    acc = None
    for i, (w, b) in enumerate(params):
        acc = jnp.dot(h, w.astype(jnp.bfloat16),
                      preferred_element_type=jnp.float32) + b
        if i < N_LAYERS - 1:
            h = jnp.maximum(acc, 0.0).astype(jnp.bfloat16)
    return acc


if __name__ == "__main__":
    key = jax.random.PRNGKey(0)
    k_x, k_p = jax.random.split(key)
    B = 8
    x = jax.random.normal(k_x, (B, IN_DIM), jnp.float32)
    params = init_params(k_p)
    w_slab, b_slab = pack_params(params)

    out = simplenn_forward(x, w_slab, b_slab)
    out = jax.block_until_ready(out)

    ref = reference_forward(x, params)
    assert out.shape == (B, NUM_CLASSES), out.shape
    assert jnp.allclose(out, ref, atol=1e-3, rtol=1e-3), "mismatch vs reference"
    print("KERNEL_OK")
</pallas_src>

<mosaic_0001>
module attributes {stable_mosaic.version = 11 : i64} {
  func.func @simplenn_kernel(%arg0: i32, %arg1: memref<8x128xbf16, #tpu.memory_space<vmem>>, %arg2: memref<6x128x128xbf16, #tpu.memory_space<vmem>>, %arg3: memref<6x1x128xf32, #tpu.memory_space<vmem>>, %arg4: memref<8x128xf32, #tpu.memory_space<vmem>>) attributes {dimension_semantics = [#tpu.dimension_semantics<parallel>], iteration_bounds = array<i64: 1>, scalar_prefetch = 0 : i64, scratch_operands = 0 : i64, tpu.core_type = #tpu.core_type<tc>, window_params = [{transform_indices = @transform_0, window_bounds = array<i64: 8, 128>}, {pipeline_mode = #tpu.pipeline_mode<synchronous>, transform_indices = @transform_1, window_bounds = array<i64: 6, 128, 128>}, {pipeline_mode = #tpu.pipeline_mode<synchronous>, transform_indices = @transform_2, window_bounds = array<i64: 6, 1, 128>}, {transform_indices = @transform_3, window_bounds = array<i64: 8, 128>}]} {
    %c0 = arith.constant 0 : index
    %c0_0 = arith.constant 0 : index
    %0 = vector.load %arg1[%c0, %c0_0] : memref<8x128xbf16, #tpu.memory_space<vmem>>, vector<8x128xbf16>
    %c0_1 = arith.constant 0 : index
    %c0_2 = arith.constant 0 : index
    %c0_3 = arith.constant 0 : index
    %1 = vector.load %arg2[%c0_1, %c0_2, %c0_3] : memref<6x128x128xbf16, #tpu.memory_space<vmem>>, vector<1x128x128xbf16>
    %2 = vector.shape_cast %1 : vector<1x128x128xbf16> to vector<128x128xbf16>
    %cst = arith.constant dense<0.000000e+00> : vector<8x128xf32>
    %3 = tpu.matmul %0, %2, %cst {dimension_numbers = #tpu.dot_dimension_numbers<[1], [0], [0], [1], [0, 0, 1, 1], [], []>} : vector<8x128xbf16>, vector<128x128xbf16>, vector<8x128xf32> -> vector<8x128xf32>
    %c0_4 = arith.constant 0 : index
    %c0_5 = arith.constant 0 : index
    %c0_6 = arith.constant 0 : index
    %4 = vector.load %arg3[%c0_4, %c0_5, %c0_6] : memref<6x1x128xf32, #tpu.memory_space<vmem>>, vector<1x1x128xf32>
    %5 = vector.shape_cast %4 : vector<1x1x128xf32> to vector<1x128xf32>
    %6 = vector.broadcast %5 : vector<1x128xf32> to vector<8x128xf32>
    %7 = arith.addf %3, %6 : vector<8x128xf32>
    %cst_7 = arith.constant 0.000000e+00 : f32
    %8 = vector.broadcast %cst_7 : f32 to vector<8x128xf32>
    %9 = arith.maximumf %7, %8 : vector<8x128xf32>
    %10 = arith.truncf %9 : vector<8x128xf32> to vector<8x128xbf16>
    %c1 = arith.constant 1 : index
    %c0_8 = arith.constant 0 : index
    %c0_9 = arith.constant 0 : index
    %11 = vector.load %arg2[%c1, %c0_8, %c0_9] : memref<6x128x128xbf16, #tpu.memory_space<vmem>>, vector<1x128x128xbf16>
    %12 = vector.shape_cast %11 : vector<1x128x128xbf16> to vector<128x128xbf16>
    %cst_10 = arith.constant dense<0.000000e+00> : vector<8x128xf32>
    %13 = tpu.matmul %10, %12, %cst_10 {dimension_numbers = #tpu.dot_dimension_numbers<[1], [0], [0], [1], [0, 0, 1, 1], [], []>} : vector<8x128xbf16>, vector<128x128xbf16>, vector<8x128xf32> -> vector<8x128xf32>
    %c1_11 = arith.constant 1 : index
    %c0_12 = arith.constant 0 : index
    %c0_13 = arith.constant 0 : index
    %14 = vector.load %arg3[%c1_11, %c0_12, %c0_13] : memref<6x1x128xf32, #tpu.memory_space<vmem>>, vector<1x1x128xf32>
    %15 = vector.shape_cast %14 : vector<1x1x128xf32> to vector<1x128xf32>
    %16 = vector.broadcast %15 : vector<1x128xf32> to vector<8x128xf32>
    %17 = arith.addf %13, %16 : vector<8x128xf32>
    %cst_14 = arith.constant 0.000000e+00 : f32
    %18 = vector.broadcast %cst_14 : f32 to vector<8x128xf32>
    %19 = arith.maximumf %17, %18 : vector<8x128xf32>
    %20 = arith.truncf %19 : vector<8x128xf32> to vector<8x128xbf16>
    %c2 = arith.constant 2 : index
    %c0_15 = arith.constant 0 : index
    %c0_16 = arith.constant 0 : index
    %21 = vector.load %arg2[%c2, %c0_15, %c0_16] : memref<6x128x128xbf16, #tpu.memory_space<vmem>>, vector<1x128x128xbf16>
    %22 = vector.shape_cast %21 : vector<1x128x128xbf16> to vector<128x128xbf16>
    %cst_17 = arith.constant dense<0.000000e+00> : vector<8x128xf32>
    %23 = tpu.matmul %20, %22, %cst_17 {dimension_numbers = #tpu.dot_dimension_numbers<[1], [0], [0], [1], [0, 0, 1, 1], [], []>} : vector<8x128xbf16>, vector<128x128xbf16>, vector<8x128xf32> -> vector<8x128xf32>
    %c2_18 = arith.constant 2 : index
    %c0_19 = arith.constant 0 : index
    %c0_20 = arith.constant 0 : index
    %24 = vector.load %arg3[%c2_18, %c0_19, %c0_20] : memref<6x1x128xf32, #tpu.memory_space<vmem>>, vector<1x1x128xf32>
    %25 = vector.shape_cast %24 : vector<1x1x128xf32> to vector<1x128xf32>
    %26 = vector.broadcast %25 : vector<1x128xf32> to vector<8x128xf32>
    %27 = arith.addf %23, %26 : vector<8x128xf32>
    %cst_21 = arith.constant 0.000000e+00 : f32
    %28 = vector.broadcast %cst_21 : f32 to vector<8x128xf32>
    %29 = arith.maximumf %27, %28 : vector<8x128xf32>
    %30 = arith.truncf %29 : vector<8x128xf32> to vector<8x128xbf16>
    %c3 = arith.constant 3 : index
    %c0_22 = arith.constant 0 : index
    %c0_23 = arith.constant 0 : index
    %31 = vector.load %arg2[%c3, %c0_22, %c0_23] : memref<6x128x128xbf16, #tpu.memory_space<vmem>>, vector<1x128x128xbf16>
    %32 = vector.shape_cast %31 : vector<1x128x128xbf16> to vector<128x128xbf16>
    %cst_24 = arith.constant dense<0.000000e+00> : vector<8x128xf32>
    %33 = tpu.matmul %30, %32, %cst_24 {dimension_numbers = #tpu.dot_dimension_numbers<[1], [0], [0], [1], [0, 0, 1, 1], [], []>} : vector<8x128xbf16>, vector<128x128xbf16>, vector<8x128xf32> -> vector<8x128xf32>
    %c3_25 = arith.constant 3 : index
    %c0_26 = arith.constant 0 : index
    %c0_27 = arith.constant 0 : index
    %34 = vector.load %arg3[%c3_25, %c0_26, %c0_27] : memref<6x1x128xf32, #tpu.memory_space<vmem>>, vector<1x1x128xf32>
    %35 = vector.shape_cast %34 : vector<1x1x128xf32> to vector<1x128xf32>
    %36 = vector.broadcast %35 : vector<1x128xf32> to vector<8x128xf32>
    %37 = arith.addf %33, %36 : vector<8x128xf32>
    %cst_28 = arith.constant 0.000000e+00 : f32
    %38 = vector.broadcast %cst_28 : f32 to vector<8x128xf32>
    %39 = arith.maximumf %37, %38 : vector<8x128xf32>
    %40 = arith.truncf %39 : vector<8x128xf32> to vector<8x128xbf16>
    %c4 = arith.constant 4 : index
    %c0_29 = arith.constant 0 : index
    %c0_30 = arith.constant 0 : index
    %41 = vector.load %arg2[%c4, %c0_29, %c0_30] : memref<6x128x128xbf16, #tpu.memory_space<vmem>>, vector<1x128x128xbf16>
    %42 = vector.shape_cast %41 : vector<1x128x128xbf16> to vector<128x128xbf16>
    %cst_31 = arith.constant dense<0.000000e+00> : vector<8x128xf32>
    %43 = tpu.matmul %40, %42, %cst_31 {dimension_numbers = #tpu.dot_dimension_numbers<[1], [0], [0], [1], [0, 0, 1, 1], [], []>} : vector<8x128xbf16>, vector<128x128xbf16>, vector<8x128xf32> -> vector<8x128xf32>
    %c4_32 = arith.constant 4 : index
    %c0_33 = arith.constant 0 : index
    %c0_34 = arith.constant 0 : index
    %44 = vector.load %arg3[%c4_32, %c0_33, %c0_34] : memref<6x1x128xf32, #tpu.memory_space<vmem>>, vector<1x1x128xf32>
    %45 = vector.shape_cast %44 : vector<1x1x128xf32> to vector<1x128xf32>
    %46 = vector.broadcast %45 : vector<1x128xf32> to vector<8x128xf32>
    %47 = arith.addf %43, %46 : vector<8x128xf32>
    %cst_35 = arith.constant 0.000000e+00 : f32
    %48 = vector.broadcast %cst_35 : f32 to vector<8x128xf32>
    %49 = arith.maximumf %47, %48 : vector<8x128xf32>
    %50 = arith.truncf %49 : vector<8x128xf32> to vector<8x128xbf16>
    %c5 = arith.constant 5 : index
    %c0_36 = arith.constant 0 : index
    %c0_37 = arith.constant 0 : index
    %51 = vector.load %arg2[%c5, %c0_36, %c0_37] : memref<6x128x128xbf16, #tpu.memory_space<vmem>>, vector<1x128x128xbf16>
    %52 = vector.shape_cast %51 : vector<1x128x128xbf16> to vector<128x128xbf16>
    %cst_38 = arith.constant dense<0.000000e+00> : vector<8x128xf32>
    %53 = tpu.matmul %50, %52, %cst_38 {dimension_numbers = #tpu.dot_dimension_numbers<[1], [0], [0], [1], [0, 0, 1, 1], [], []>} : vector<8x128xbf16>, vector<128x128xbf16>, vector<8x128xf32> -> vector<8x128xf32>
    %c5_39 = arith.constant 5 : index
    %c0_40 = arith.constant 0 : index
    %c0_41 = arith.constant 0 : index
    %54 = vector.load %arg3[%c5_39, %c0_40, %c0_41] : memref<6x1x128xf32, #tpu.memory_space<vmem>>, vector<1x1x128xf32>
    %55 = vector.shape_cast %54 : vector<1x1x128xf32> to vector<1x128xf32>
    %56 = vector.broadcast %55 : vector<1x128xf32> to vector<8x128xf32>
    %57 = arith.addf %53, %56 : vector<8x128xf32>
    %c0_42 = arith.constant 0 : index
    %c0_43 = arith.constant 0 : index
    %58 = vector.load %arg4[%c0_42, %c0_43] : memref<8x128xf32, #tpu.memory_space<vmem>>, vector<8x128xf32>
    tpu.vector_store %arg4[%c0_42, %c0_43], %57 {strides = array<i32>} : memref<8x128xf32, #tpu.memory_space<vmem>>, vector<8x128xf32>,
    return
  }
  func.func @transform_0(%arg0: i32) -> (i32, i32) {
    %c0_i32 = arith.constant 0 : i32
    %c0_i32_0 = arith.constant 0 : i32
    return %arg0, %c0_i32 : i32, i32
  }
  func.func @transform_1(%arg0: i32) -> (i32, i32, i32) {
    %c0_i32 = arith.constant 0 : i32
    %c0_i32_0 = arith.constant 0 : i32
    %c0_i32_1 = arith.constant 0 : i32
    %c0_i32_2 = arith.constant 0 : i32
    return %c0_i32, %c0_i32_0, %c0_i32_1 : i32, i32, i32
  }
  func.func @transform_2(%arg0: i32) -> (i32, i32, i32) {
    %c0_i32 = arith.constant 0 : i32
    %c0_i32_0 = arith.constant 0 : i32
    %c0_i32_1 = arith.constant 0 : i32
    %c0_i32_2 = arith.constant 0 : i32
    return %c0_i32, %c0_i32_0, %c0_i32_1 : i32, i32, i32
  }
  func.func @transform_3(%arg0: i32) -> (i32, i32) {
    %c0_i32 = arith.constant 0 : i32
    %c0_i32_0 = arith.constant 0 : i32
    return %arg0, %c0_i32 : i32, i32
  }
}

</mosaic_0001>

<bundles_post_ra>
// kernel: simplenn_forward.1
= control target key start
LH: loop header
LB: loop body
LE: loop exit
PB: predicated region body
PF: predicated region fallthrough
CT: control target
= control target key end

     0   :  { %8 = vsyncpa [#allocation3], 0  ;;  %s1277_s0 = inlined_call_operand.hbm [shape: bf16[8,128], index: 0, kind: input, shape index: {}]   ;;  %s1278_s1 = inlined_call_operand.hbm [shape: bf16[6,128,128], index: 1, kind: input, shape index: {}]   ;;  %s1279_s2 = inlined_call_operand.hbm [shape: f32[6,1,128], index: 2, kind: input, shape index: {}]   ;;  %s1280_s3 = inlined_call_operand.hbm [shape: f32[8,128], index: 3, kind: output, shape index: {}]  }
   0x1   :  { %9 = vsyncpa [#allocation6], 0 }
   0x2   :  { %10 = vsyncpa [#allocation4], 0  ;;  %s1139_s12 = smov [#allocation5]   ;;  %s1045_s16 = scalar_lea.hbm %s1278_s1, 6144 }
   0x3   :  { %s26_s13 = sshll.u32 %s1139_s12, 4  ;;  %p1046_p0 = scmp.ne.s32.totalorder %s1278_s1, %s1045_s16  ;;  %s27_s13 = int_to_ptr.vmem [resolvable:$true] %s26_s13 }
   0x4   :  { %p1049_p1 = scmp.lt.u32.totalorder %s1045_s16, %s1278_s1 }
   0x6   :  { %p1051_p2 = pnand %p1049_p1, %p1046_p0 }
   0x8   :  { %1054 = shalt.err (!%p1051_p2)
}
   0x9   :  { %s1055_s21 = scalar_lea.vmem %s27_s13, 6144  ;;  %p1060_p4 = scmp.lt.s32.totalorder %s27_s13, %s27_s13 }
   0xa   :  { %p1056_p3 = scmp.ne.s32.totalorder %s27_s13, %s1055_s21  ;;  %p1061_p5 = scmp.lt.s32.totalorder %s1055_s21, %s1055_s21 }
   0xc   :  { %p1062_p6 = por %p1061_p5, %p1060_p4 }
   0xe   :  { %p1063_p7 = pnand %p1062_p6, %p1056_p3 }
  0x10   :  { %1066 = shalt.err (!%p1063_p7)
}
  0x11   :  { %s1140_s22 = smov 64   ;;  %s1141_s23 = smov 4  }
  0x12   :  { %32 = dma.hbm_to_vmem [thread:$0]  %s1278_s1, 6144, %s27_s13, [#allocation6], %s1140_s22, %s1140_s22, %s1141_s23  }
  0x13   :  { %s1142_s26 = smov [#allocation2]   ;;  %s1143_s28 = smov [#allocation7]  }
  0x14   :  { %s17_s27 = sshll.u32 %s1142_s26, 4  ;;  %s38_s29 = sshll.u32 %s1143_s28, 4  ;;  %s18_s27 = int_to_ptr.vmem [resolvable:$true] %s17_s27  ;;  %s39_s29 = int_to_ptr.vmem [resolvable:$true] %s38_s29 }
  0x15   :  { %s1067_s5 = scalar_lea.hbm %s1277_s0, 64 }
  0x16   :  { %p1068_p8 = scmp.ne.s32.totalorder %s1277_s0, %s1067_s5  ;;  %p1071_p9 = scmp.lt.u32.totalorder %s1067_s5, %s1277_s0 }
  0x18   :  { %p1073_p10 = pnand %p1071_p9, %p1068_p8 }
  0x1a   :  { %1076 = shalt.err (!%p1073_p10)
}
  0x1b   :  { %s1077_s1 = scalar_lea.vmem %s18_s27, 64  ;;  %p1082_p12 = scmp.lt.s32.totalorder %s18_s27, %s18_s27 }
  0x1c   :  { %p1078_p11 = scmp.ne.s32.totalorder %s18_s27, %s1077_s1  ;;  %p1083_p13 = scmp.lt.s32.totalorder %s1077_s1, %s1077_s1 }
  0x1e   :  { %p1084_p0 = por %p1083_p13, %p1082_p12 }
  0x20   :  { %p1085_p1 = pnand %p1084_p0, %p1078_p11 }
  0x22   :  { %1088 = shalt.err (!%p1085_p1)
}
  0x23   :  { %20 = dma.hbm_to_vmem [thread:$0]  %s1277_s0, 64, %s18_s27, [#allocation3]  }
  0x24   :  { %s1089_s14 = scalar_lea.hbm %s1279_s2, 96 }
  0x25   :  { %p1090_p2 = scmp.ne.s32.totalorder %s1279_s2, %s1089_s14  ;;  %p1093_p3 = scmp.lt.u32.totalorder %s1089_s14, %s1279_s2 }
  0x27   :  { %p1095_p4 = pnand %p1093_p3, %p1090_p2 }
  0x29   :  { %1098 = shalt.err (!%p1095_p4)
}
  0x2a   :  { %s1099_s19 = scalar_lea.vmem %s39_s29, 96  ;;  %p1104_p6 = scmp.lt.s32.totalorder %s39_s29, %s39_s29 }
  0x2b   :  { %p1100_p5 = scmp.ne.s32.totalorder %s39_s29, %s1099_s19  ;;  %p1105_p7 = scmp.lt.s32.totalorder %s1099_s19, %s1099_s19 }
  0x2d   :  { %p1106_p8 = por %p1105_p7, %p1104_p6 }
  0x2f   :  { %p1107_p9 = pnand %p1106_p8, %p1100_p5 }
  0x31   :  { %1110 = shalt.err (!%p1107_p9)
}
  0x32   :  { %s1144_s0 = smov 16   ;;  %s1145_s20 = smov 1  }
  0x33   :  { %44 = dma.hbm_to_vmem [thread:$0]  %s1279_s2, 96, %s39_s29, [#allocation6], %s1144_s0, %s1144_s0, %s1145_s20  }
  0x34   :  { %1133 = dma.done.wait [#allocation3], 64  }
  0x35   :  { %1134 = vsyncadd [#allocation3], 4294967232 }
  0x36   :  { %1135 = dma.done.wait [#allocation6], 6240  }
  0x37   :  { %1136 = vsyncadd [#allocation6], 4294961056  ;;  %v1146_v0 = vmov 0.0   ;;  %vm1147_vm0 = vmmov 0   ;;  %v997_v1 = vld [vmem:[#allocation5] sm:$0xff]   ;;  %v998_v2 = vld [vmem:[#allocation5 + $0x8] sm:$0xff]  }
  0x38   :  { %867 = vmatprep.subr.bf16.mxu0 %v1146_v0  ;;  %883 = vmatprep.mubr.msk.bf16.mxu0 %vm1147_vm0, %v1146_v0  ;;  %v999_v3 = vld [vmem:[#allocation5 + $0x10] sm:$0xff]   ;;  %v1005_v4 = vld [vmem:[#allocation5 + $0x40] sm:$0xff]   ;;  %v1000_v5 = vld [vmem:[#allocation5 + $0x18] sm:$0xff]   ;;  %s1148_s2 = smov [#allocation8]  }
  0x39   :  { %887 = vmatprep.subr.bf16.mxu1 %v1146_v0  ;;  %903 = vmatprep.mubr.msk.bf16.mxu1 %vm1147_vm0, %v1146_v0  ;;  %v1006_v6 = vld [vmem:[#allocation5 + $0x48] sm:$0xff]   ;;  %v1001_v7 = vld [vmem:[#allocation5 + $0x20] sm:$0xff]   ;;  %v1007_v8 = vld [vmem:[#allocation5 + $0x50] sm:$0xff]   ;;  %s749_s23 = sshll.u32 %s1148_s2, 4  ;;  %s750_s23 = int_to_ptr.vmem [resolvable:$true] %s749_s23 }
  0x3a   :  { %868 = vmatpush3.bf16.msra.mxu0 %v997_v1  ;;  %888 = vmatpush3.bf16.msra.mxu1 %v1005_v4  ;;  %v1002_v9 = vld [vmem:[#allocation5 + $0x28] sm:$0xff]   ;;  %v1008_v10 = vld [vmem:[#allocation5 + $0x58] sm:$0xff]   ;;  %v1003_v11 = vld [vmem:[#allocation5 + $0x30] sm:$0xff]   ;;  %s1111_s24 = scalar_lea.vmem %s750_s23, 128  ;;  %p1116_p11 = scmp.lt.s32.totalorder %s750_s23, %s750_s23 }
  0x3b   :  { %869 = vmatprep.subr.bf16.mxu0 %v1146_v0  ;;  %889 = vmatprep.subr.bf16.mxu1 %v1146_v0  ;;  %v1009_v12 = vld [vmem:[#allocation5 + $0x60] sm:$0xff]   ;;  %v1004_v13 = vld [vmem:[#allocation5 + $0x38] sm:$0xff]   ;;  %v1010_v14 = vld [vmem:[#allocation5 + $0x68] sm:$0xff]   ;;  %p1112_p10 = scmp.ne.s32.totalorder %s750_s23, %s1111_s24  ;;  %p1117_p12 = scmp.lt.s32.totalorder %s1111_s24, %s1111_s24 }
  0x3c   :  { %v55_v15 = vld [vmem:[#allocation2] sm:$0xf]  ;;  %v1011_v16 = vld [vmem:[#allocation5 + $0x70] sm:$0xff]   ;;  %v1013_v18 = vld [vmem:[#allocation5 + $0x80] sm:$0xff]  }
  0x3d   :  { %v1012_v17 = vld [vmem:[#allocation5 + $0x78] sm:$0xff]   ;;  %v1014_v19 = vld [vmem:[#allocation5 + $0x88] sm:$0xff]   ;;  %v1015_v20 = vld [vmem:[#allocation5 + $0x90] sm:$0xff]   ;;  %p1118_p13 = por %p1117_p12, %p1116_p11 }
  0x3e   :  { %870 = vmatpush3.bf16.msra.mxu0 %v998_v2  ;;  %890 = vmatpush3.bf16.msra.mxu1 %v1006_v6  ;;  %v1016_v21 = vld [vmem:[#allocation5 + $0x98] sm:$0xff]   ;;  %v1017_v22 = vld [vmem:[#allocation5 + $0xa0] sm:$0xff]   ;;  %v1018_v23 = vld [vmem:[#allocation5 + $0xa8] sm:$0xff]  }
  0x3f   :  { %871 = vmatprep.subr.bf16.mxu0 %v1146_v0  ;;  %891 = vmatprep.subr.bf16.mxu1 %v1146_v0  ;;  %v759_v24 = vld [vmem:[#allocation7] ss:$0 sm:$0xff]  ;;  %v1019_v32 = vld [vmem:[#allocation5 + $0xb0] sm:$0xff]   ;;  %v1020_v33 = vld [vmem:[#allocation5 + $0xb8] sm:$0xff]   ;;  %p1119_p0 = pnand %p1118_p13, %p1112_p10 }
  0x40   :  { %v1021_v34 = vld [vmem:[#allocation5 + $0xc0] sm:$0xff]   ;;  %v1022_v35 = vld [vmem:[#allocation5 + $0xc8] sm:$0xff]   ;;  %v1023_v36 = vld [vmem:[#allocation5 + $0xd0] sm:$0xff]  }
  0x41   :  { %v1024_v37 = vld [vmem:[#allocation5 + $0xd8] sm:$0xff]   ;;  %v1025_v38 = vld [vmem:[#allocation5 + $0xe0] sm:$0xff]   ;;  %v1026_v39 = vld [vmem:[#allocation5 + $0xe8] sm:$0xff]  }
  0x42   :  { %872 = vmatpush3.bf16.msra.mxu0 %v999_v3  ;;  %892 = vmatpush3.bf16.msra.mxu1 %v1007_v8  ;;  %v768_v40 = vld [vmem:[#allocation7 + $0x1] ss:$0 sm:$0xff]  ;;  %v1027_v48 = vld [vmem:[#allocation5 + $0xf0] sm:$0xff]   ;;  %v1028_v49 = vld [vmem:[#allocation5 + $0xf8] sm:$0xff]  }
  0x43   :  { %873 = vmatprep.subr.bf16.mxu0 %v1146_v0  ;;  %893 = vmatprep.subr.bf16.mxu1 %v1146_v0  ;;  %v1029_v50 = vld [vmem:[#allocation5 + $0x100] sm:$0xff]   ;;  %v1030_v51 = vld [vmem:[#allocation5 + $0x108] sm:$0xff]   ;;  %v1031_v52 = vld [vmem:[#allocation5 + $0x110] sm:$0xff]  }
  0x44   :  { %v1032_v53 = vld [vmem:[#allocation5 + $0x118] sm:$0xff]   ;;  %v1033_v54 = vld [vmem:[#allocation5 + $0x120] sm:$0xff]   ;;  %v1034_v55 = vld [vmem:[#allocation5 + $0x128] sm:$0xff]  }
  0x45   :  { %v777_v56 = vld [vmem:[#allocation7 + $0x2] ss:$0 sm:$0xff]  ;;  %v1035_v1 = vld [vmem:[#allocation5 + $0x130] sm:$0xff]   ;;  %v1036_v2 = vld [vmem:[#allocation5 + $0x138] sm:$0xff]  }
  0x46   :  { %874 = vmatpush3.bf16.msra.mxu0 %v1000_v5  ;;  %894 = vmatpush3.bf16.msra.mxu1 %v1008_v10  ;;  %v1037_v3 = vld [vmem:[#allocation5 + $0x140] sm:$0xff]   ;;  %v1038_v4 = vld [vmem:[#allocation5 + $0x148] sm:$0xff]   ;;  %v1039_v5 = vld [vmem:[#allocation5 + $0x150] sm:$0xff]  }
  0x47   :  { %875 = vmatprep.subr.bf16.mxu0 %v1146_v0  ;;  %895 = vmatprep.subr.bf16.mxu1 %v1146_v0  ;;  %v1040_v6 = vld [vmem:[#allocation5 + $0x158] sm:$0xff]   ;;  %v1042_v8 = vld [vmem:[#allocation5 + $0x168] sm:$0xff]  }
  0x4a   :  { %876 = vmatpush3.bf16.msra.mxu0 %v1001_v7  ;;  %896 = vmatpush3.bf16.msra.mxu1 %v1009_v12  ;;  %v1041_v7 = vld [vmem:[#allocation5 + $0x160] sm:$0xff]  }
  0x4b   :  { %877 = vmatprep.subr.bf16.mxu0 %v1146_v0  ;;  %897 = vmatprep.subr.bf16.mxu1 %v1146_v0 }
  0x4e   :  { %878 = vmatpush3.bf16.msra.mxu0 %v1002_v9  ;;  %898 = vmatpush3.bf16.msra.mxu1 %v1010_v14  ;;  %v786_v9 = vld [vmem:[#allocation7 + $0x3] ss:$0 sm:$0xff] }
  0x4f   :  { %879 = vmatprep.subr.bf16.mxu0 %v1146_v0  ;;  %899 = vmatprep.subr.bf16.mxu1 %v1146_v0 }
  0x52   :  { %880 = vmatpush3.bf16.msra.mxu0 %v1003_v11  ;;  %900 = vmatpush3.bf16.msra.mxu1 %v1011_v16 }
  0x53   :  { %881 = vmatprep.subr.bf16.mxu0 %v1146_v0  ;;  %901 = vmatprep.subr.bf16.mxu1 %v1146_v0 }
  0x56   :  { %882 = vmatpush3.bf16.msra.mxu0 %v1004_v13  ;;  %902 = vmatpush3.bf16.msra.mxu1 %v1012_v17  ;;  %v1043_v17 = vld [vmem:[#allocation5 + $0x170] sm:$0xff]  }
  0x57   :  { %907 = vmatprep.subr.bf16.mxu0 %v1146_v0  ;;  %927 = vmatprep.subr.bf16.mxu1 %v1146_v0 }
  0x59   :  { %884 = vmatmul.mubr.bf16.vlgmr.msra.gmra.mrb[0].mxu0 %v55_v15 }
  0x5a   :  { %923 = vmatprep.mubr.msk.bf16.mxu0 %vm1147_vm0, %v1146_v0  ;;  %908 = vmatpush3.bf16.msra.mxu0 %v1013_v18  ;;  %v1044_v18 = vld [vmem:[#allocation5 + $0x178] sm:$0xff]  }
  0x5b   :  { %909 = vmatprep.subr.bf16.mxu0 %v1146_v0 }
  0x5e   :  { %910 = vmatpush3.bf16.msra.mxu0 %v1014_v19  ;;  %v795_v19 = vld [vmem:[#allocation7 + $0x4] ss:$0 sm:$0xff] }
  0x5f   :  { %911 = vmatprep.subr.bf16.mxu0 %v1146_v0 }
  0x62   :  { %912 = vmatpush3.bf16.msra.mxu0 %v1015_v20 }
  0x63   :  { %913 = vmatprep.subr.bf16.mxu0 %v1146_v0 }
  0x66   :  { %914 = vmatpush3.bf16.msra.mxu0 %v1016_v21 }
  0x67   :  { %915 = vmatprep.subr.bf16.mxu0 %v1146_v0 }
  0x6a   :  { %916 = vmatpush3.bf16.msra.mxu0 %v1017_v22 }
  0x6b   :  { %917 = vmatprep.subr.bf16.mxu0 %v1146_v0 }
  0x6e   :  { %918 = vmatpush3.bf16.msra.mxu0 %v1018_v23 }
  0x6f   :  { %919 = vmatprep.subr.bf16.mxu0 %v1146_v0 }
  0x72   :  { %920 = vmatpush3.bf16.msra.mxu0 %v1019_v32 }
  0x73   :  { %921 = vmatprep.subr.bf16.mxu0 %v1146_v0 }
  0x76   :  { %922 = vmatpush3.bf16.msra.mxu0 %v1020_v33 }
  0x77   :  { %947 = vmatprep.subr.bf16.mxu0 %v1146_v0 }
 0x12c   :  { %v161_v25 = vpop.f32.mrb[0].mxu0 }
 0x12d   :  { %v162_v26 = vadd.f32 %v759_v24, %v161_v25  ;;  %v885_v27 = vpop.f32.mrb[1].mxu0 }
 0x12e   :  { %v164_v28 = vpop.f32.mrb[2].mxu0  ;;  %v804_v27 = vld [vmem:[#allocation7 + $0x5] ss:$0 sm:$0xff] }
 0x12f   :  { %v167_v29 = vmax.f32 %v162_v26, 0.0  ;;  %v886_v30 = vpop.f32.mrb[3].mxu0 }
 0x131   :  { %v168_v31 = vpack.c.bf16 %v167_v29, %v167_v29 }
 0x133   :  { %904 = vmatmul.mubr.bf16.vlgmr.msra.gmra.mrb[0].mxu1 %v168_v31 }
 0x134   :  { %943 = vmatprep.mubr.msk.bf16.mxu1 %vm1147_vm0, %v1146_v0  ;;  %928 = vmatpush3.bf16.msra.mxu1 %v1021_v34 }
 0x135   :  { %929 = vmatprep.subr.bf16.mxu1 %v1146_v0 }
 0x138   :  { %930 = vmatpush3.bf16.msra.mxu1 %v1022_v35 }
 0x139   :  { %931 = vmatprep.subr.bf16.mxu1 %v1146_v0 }
 0x13c   :  { %932 = vmatpush3.bf16.msra.mxu1 %v1023_v36 }
 0x13d   :  { %933 = vmatprep.subr.bf16.mxu1 %v1146_v0 }
 0x140   :  { %934 = vmatpush3.bf16.msra.mxu1 %v1024_v37 }
 0x141   :  { %935 = vmatprep.subr.bf16.mxu1 %v1146_v0 }
 0x144   :  { %936 = vmatpush3.bf16.msra.mxu1 %v1025_v38 }
 0x145   :  { %937 = vmatprep.subr.bf16.mxu1 %v1146_v0 }
 0x148   :  { %938 = vmatpush3.bf16.msra.mxu1 %v1026_v39 }
 0x149   :  { %939 = vmatprep.subr.bf16.mxu1 %v1146_v0 }
 0x14c   :  { %940 = vmatpush3.bf16.msra.mxu1 %v1027_v48 }
 0x14d   :  { %941 = vmatprep.subr.bf16.mxu1 %v1146_v0 }
 0x150   :  { %942 = vmatpush3.bf16.msra.mxu1 %v1028_v49 }
 0x151   :  { %967 = vmatprep.subr.bf16.mxu1 %v1146_v0 }
 0x206   :  { %v276_v41 = vpop.f32.mrb[0].mxu1 }
 0x207   :  { %v277_v42 = vadd.f32 %v768_v40, %v276_v41  ;;  %v905_v43 = vpop.f32.mrb[1].mxu1 }
 0x208   :  { %v279_v44 = vpop.f32.mrb[2].mxu1 }
 0x209   :  { %v282_v45 = vmax.f32 %v277_v42, 0.0  ;;  %v906_v46 = vpop.f32.mrb[3].mxu1 }
 0x20b   :  { %v283_v47 = vpack.c.bf16 %v282_v45, %v282_v45 }
 0x20d   :  { %924 = vmatmul.mubr.bf16.vlgmr.msra.gmra.mrb[4].mxu0 %v283_v47 }
 0x20e   :  { %963 = vmatprep.mubr.msk.bf16.mxu0 %vm1147_vm0, %v1146_v0  ;;  %948 = vmatpush3.bf16.msra.mxu0 %v1029_v50 }
 0x20f   :  { %949 = vmatprep.subr.bf16.mxu0 %v1146_v0 }
 0x212   :  { %950 = vmatpush3.bf16.msra.mxu0 %v1030_v51 }
 0x213   :  { %951 = vmatprep.subr.bf16.mxu0 %v1146_v0 }
 0x216   :  { %952 = vmatpush3.bf16.msra.mxu0 %v1031_v52 }
 0x217   :  { %953 = vmatprep.subr.bf16.mxu0 %v1146_v0 }
 0x21a   :  { %954 = vmatpush3.bf16.msra.mxu0 %v1032_v53 }
 0x21b   :  { %955 = vmatprep.subr.bf16.mxu0 %v1146_v0 }
 0x21e   :  { %956 = vmatpush3.bf16.msra.mxu0 %v1033_v54 }
 0x21f   :  { %957 = vmatprep.subr.bf16.mxu0 %v1146_v0 }
 0x222   :  { %958 = vmatpush3.bf16.msra.mxu0 %v1034_v55 }
 0x223   :  { %959 = vmatprep.subr.bf16.mxu0 %v1146_v0 }
 0x226   :  { %960 = vmatpush3.bf16.msra.mxu0 %v1035_v1 }
 0x227   :  { %961 = vmatprep.subr.bf16.mxu0 %v1146_v0 }
 0x22a   :  { %962 = vmatpush3.bf16.msra.mxu0 %v1036_v2 }
 0x2e0   :  { %v391_v57 = vpop.f32.mrb[4].mxu0 }
 0x2e1   :  { %v392_v58 = vadd.f32 %v777_v56, %v391_v57  ;;  %v925_v59 = vpop.f32.mrb[5].mxu0 }
 0x2e2   :  { %v394_v60 = vpop.f32.mrb[6].mxu0 }
 0x2e3   :  { %v397_v61 = vmax.f32 %v392_v58, 0.0  ;;  %v926_v62 = vpop.f32.mrb[7].mxu0 }
 0x2e5   :  { %v398_v63 = vpack.c.bf16 %v397_v61, %v397_v61 }
 0x2e7   :  { %944 = vmatmul.mubr.bf16.vlgmr.msra.gmra.mrb[4].mxu1 %v398_v63 }
 0x2e8   :  { %983 = vmatprep.mubr.msk.bf16.mxu1 %vm1147_vm0, %v1146_v0  ;;  %968 = vmatpush3.bf16.msra.mxu1 %v1037_v3 }
 0x2e9   :  { %969 = vmatprep.subr.bf16.mxu1 %v1146_v0 }
 0x2ec   :  { %970 = vmatpush3.bf16.msra.mxu1 %v1038_v4 }
 0x2ed   :  { %971 = vmatprep.subr.bf16.mxu1 %v1146_v0 }
 0x2f0   :  { %972 = vmatpush3.bf16.msra.mxu1 %v1039_v5 }
 0x2f1   :  { %973 = vmatprep.subr.bf16.mxu1 %v1146_v0 }
 0x2f4   :  { %974 = vmatpush3.bf16.msra.mxu1 %v1040_v6 }
 0x2f5   :  { %975 = vmatprep.subr.bf16.mxu1 %v1146_v0 }
 0x2f8   :  { %976 = vmatpush3.bf16.msra.mxu1 %v1041_v7 }
 0x2f9   :  { %977 = vmatprep.subr.bf16.mxu1 %v1146_v0 }
 0x2fc   :  { %978 = vmatpush3.bf16.msra.mxu1 %v1042_v8 }
 0x2fd   :  { %979 = vmatprep.subr.bf16.mxu1 %v1146_v0 }
 0x300   :  { %980 = vmatpush3.bf16.msra.mxu1 %v1043_v17 }
 0x301   :  { %981 = vmatprep.subr.bf16.mxu1 %v1146_v0 }
 0x304   :  { %982 = vmatpush3.bf16.msra.mxu1 %v1044_v18 }
 0x3ba   :  { %v506_v10 = vpop.f32.mrb[4].mxu1 }
 0x3bb   :  { %v507_v11 = vadd.f32 %v786_v9, %v506_v10  ;;  %v945_v12 = vpop.f32.mrb[5].mxu1 }
 0x3bc   :  { %v509_v13 = vpop.f32.mrb[6].mxu1 }
 0x3bd   :  { %v512_v14 = vmax.f32 %v507_v11, 0.0  ;;  %v946_v15 = vpop.f32.mrb[7].mxu1 }
 0x3bf   :  { %v513_v16 = vpack.c.bf16 %v512_v14, %v512_v14 }
 0x3c1   :  { %964 = vmatmul.mubr.bf16.vlgmr.msra.gmra.mrb[8].mxu0 %v513_v16 }
 0x494   :  { %v621_v20 = vpop.f32.mrb[8].mxu0 }
 0x495   :  { %v622_v21 = vadd.f32 %v795_v19, %v621_v20  ;;  %v965_v22 = vpop.f32.mrb[9].mxu0 }
 0x496   :  { %v624_v23 = vpop.f32.mrb[10].mxu0 }
 0x497   :  { %v627_v24 = vmax.f32 %v622_v21, 0.0  ;;  %v966_v25 = vpop.f32.mrb[11].mxu0 }
 0x499   :  { %v628_v26 = vpack.c.bf16 %v627_v24, %v627_v24 }
 0x49b   :  { %984 = vmatmul.mubr.bf16.vlgmr.msra.gmra.mrb[8].mxu1 %v628_v26 }
 0x56e   :  { %v736_v28 = vpop.f32.mrb[8].mxu1 }
 0x56f   :  { %v737_v29 = vadd.f32 %v804_v27, %v736_v28  ;;  %v985_v30 = vpop.f32.mrb[9].mxu1 }
 0x570   :  { %v739_v31 = vpop.f32.mrb[10].mxu1 }
 0x571   :  { %742 = vst [vmem:[#allocation8] sm:$0xff] %v737_v29  ;;  %v986_v0 = vpop.f32.mrb[11].mxu1 }
 0x572   :  { %1122 = shalt.err (!%p1119_p0)
}
 0x573   :  { %s1123_s27 = scalar_lea.hbm %s1280_s3, 128 }
 0x574   :  { %p1124_p1 = scmp.ne.s32.totalorder %s1280_s3, %s1123_s27  ;;  %p1127_p2 = scmp.lt.u32.totalorder %s1123_s27, %s1280_s3 }
 0x576   :  { %p1129_p3 = pnand %p1127_p2, %p1124_p1 }
 0x578   :  { %1132 = shalt.err (!%p1129_p3)
}
 0x579   :  { %752 = dma.vmem_to_hbm [thread:$0]  %s750_s23, 128, %s1280_s3, [#allocation4]  }
 0x57a   :  { %1137 = dma.done.wait [#allocation4], 128  }
 0x57b   :  { %1138 = vsyncadd [#allocation4], 4294967168 }
 0x57c   :  { %756 = vsyncpa [#allocation3], 1 }
 0x57d   :  { %757 = vsyncpa [#allocation6], 1 }
 0x57e   :  { %758 = vsyncpa [#allocation4], 1 }

</bundles_post_ra>
